<compile_context>
chip_gen: v5e
topology: v5e:2x2
jax: 0.10.0
libtpu: 0.0.40
codegen_flags: <defaults>
</compile_context>

<pallas_src>
import jax
import jax.numpy as jnp
from jax.experimental import pallas as pl
from jax.experimental.pallas import tpu as pltpu

EPS = 1e-5


# ----------------------------- Pallas kernel -------------------------------- #
def _attention_gate_kernel(scal_ref,                      # SMEM (2,): [w_psi_mask, b_psi]
                           g_ref, x_ref, m_ref,           # (F_l,TP), (F_g,TP), (1,TP)
                           wg_ref, wx_ref, b_ref, wps_ref,
                           out_ref):                      # (F_g, TP)
    # widen-on-load: I/O may be bf16, all compute stays f32
    g = g_ref[...].astype(jnp.float32)
    x = x_ref[...].astype(jnp.float32)
    m = m_ref[...].astype(jnp.float32)

    # g1 + x1 = Wg^T g + Wx^T x + (bg + bx)   (BN folded, biases pre-summed)
    g1x1 = (jnp.dot(wg_ref[...], g, preferred_element_type=jnp.float32)
            + jnp.dot(wx_ref[...], x, preferred_element_type=jnp.float32)
            + b_ref[...])                                  # (F_int, TP)

    # relu(cat([g1 + x1, mask], ch)) == cat([relu(g1 + x1), relu(mask)], ch)
    s = jnp.maximum(g1x1, 0.0)                             # (F_int, TP)
    m_relu = jnp.maximum(m, 0.0)                           # (1, TP)

    # psi = sigmoid(BN(Conv1x1(cat))): (F_int+1)->1 conv split into the F_int-wide
    # matmul plus the scalar mask-channel contribution (scalars from SMEM).
    pre = (jnp.dot(wps_ref[...], s, preferred_element_type=jnp.float32)
           + m_relu * scal_ref[0] + scal_ref[1])           # (1, TP)
    psi = jax.nn.sigmoid(pre)

    out_ref[...] = (x * psi).astype(out_ref.dtype)


# ----------------------------- tiling helpers -------------------------------- #
def _round_up(v, m):
    return -(-v // m) * m


def _choose_tile_hw(HW, N, *, max_tile=8192, target_steps=8):
    """Lane-dense pixel tile aiming for ~target_steps pipelined grid steps total."""
    if HW <= 128:
        return HW                              # full-extent block (legal, tiny case)
    steps_hw = max(1, -(-target_steps // max(N, 1)))
    tile = _round_up(-(-HW // steps_hw), 128)  # ceil(HW/steps) rounded to 128 lanes
    hw128 = _round_up(HW, 128)
    return max(128, min(tile, max_tile, hw128))


# ----------------------------- pallas_call wrapper --------------------------- #
def attention_block_pallas(g_ncp, x_ncp, m_ncp, folded, *, tile_hw=None):
    N, F_l, HW = g_ncp.shape
    F_g = x_ncp.shape[1]

    if tile_hw is None:
        tile_hw = _choose_tile_hw(HW, N)
    grid = (N, pl.cdiv(HW, tile_hw))

    def data_spec(c):
        # N dim squeezed out of the kernel view; kernel sees (c, tile_hw)
        return pl.BlockSpec((None, c, tile_hw), lambda n, i: (n, 0, i))

    def wspec(shape):
        return pl.BlockSpec(shape, lambda n, i: (0, 0))

    return pl.pallas_call(
        _attention_gate_kernel,
        out_shape=jax.ShapeDtypeStruct((N, F_g, HW), x_ncp.dtype),
        grid_spec=pltpu.PrefetchScalarGridSpec(
            num_scalar_prefetch=0,
            grid=grid,
            in_specs=[
                pl.BlockSpec(memory_space=pltpu.MemorySpace.SMEM),  # [wpm, bp] scalars
                data_spec(F_l),                                     # g tile
                data_spec(F_g),                                     # x tile
                data_spec(1),                                       # mask tile
                wspec(folded["wg_t"].shape),                        # (F_int, F_l)
                wspec(folded["wx_t"].shape),                        # (F_int, F_g)
                wspec(folded["b_gx"].shape),                        # (F_int, 1)
                wspec(folded["wps_t"].shape),                       # (1, F_int)
            ],
            out_specs=data_spec(F_g),
        ),
        compiler_params=pltpu.CompilerParams(
            dimension_semantics=("parallel", "parallel")),
    )(folded["scal"], g_ncp, x_ncp, m_ncp,
      folded["wg_t"], folded["wx_t"], folded["b_gx"], folded["wps_t"])


# ------------------------------ JAX glue ------------------------------------ #
def nearest_resize_nchw(m, out_hw):
    # torch.nn.functional.interpolate(mode='nearest'): src = floor(dst * in/out)
    _, _, hin, win = m.shape
    hout, wout = out_hw
    hi = (jnp.arange(hout) * hin) // hout
    wi = (jnp.arange(wout) * win) // wout
    return m[:, :, hi[:, None], wi[None, :]]


def fold_conv_bn(w, b, gamma, beta, mean, var):
    # w: (Cin, Cout), b: (Cout,) ; eval-mode BatchNorm folded into conv.
    scale = gamma / jnp.sqrt(var + EPS)
    return w * scale[None, :], (b - mean) * scale + beta


def make_params(key, F_g, F_l, F_int):
    ks = jax.random.split(key, 6)

    def conv_bn_params(kw, kb, cin, cout):
        return {
            "w": jax.random.normal(kw, (cin, cout), jnp.float32) * 0.2,
            "b": jax.random.normal(kb, (cout,), jnp.float32) * 0.1,
            "gamma": 1.0 + 0.1 * jnp.arange(cout, dtype=jnp.float32),
            "beta": 0.05 * jnp.arange(cout, dtype=jnp.float32),
            "mean": 0.02 * jnp.arange(cout, dtype=jnp.float32),
            "var": 1.0 + 0.03 * jnp.arange(cout, dtype=jnp.float32),
        }

    return {
        "W_g": conv_bn_params(ks[0], ks[1], F_l, F_int),      # applied to g
        "W_x": conv_bn_params(ks[2], ks[3], F_g, F_int),      # applied to x
        "psi": conv_bn_params(ks[4], ks[5], F_int + 1, 1),
    }


def fold_params(raw, F_int):
    wg, bg = fold_conv_bn(**raw["W_g"])       # (F_l, F_int), (F_int,)
    wx, bx = fold_conv_bn(**raw["W_x"])       # (F_g, F_int), (F_int,)
    wp, bp = fold_conv_bn(**raw["psi"])       # (F_int+1, 1), (1,)
    return {
        "wg_t": jnp.transpose(wg),                        # (F_int, F_l)
        "wx_t": jnp.transpose(wx),                        # (F_int, F_g)
        "b_gx": (bg + bx).reshape(F_int, 1),              # combined folded bias
        "wps_t": jnp.transpose(wp[:F_int, :]),            # (1, F_int)
        "scal": jnp.stack([wp[F_int, 0], bp[0]]).astype(jnp.float32),  # SMEM: [wpm, bp]
    }


def attention_block(g, x, masks, raw, *, tile_hw=None):
    # I/O dtype follows the activations (bf16 halves HBM traffic; compute stays f32).
    n, c_g, h, w = g.shape
    c_x = x.shape[1]
    F_int = raw["W_g"]["w"].shape[1]
    folded = fold_params(raw, F_int)

    m_rs = nearest_resize_nchw(masks.astype(x.dtype), (h, w))

    # metadata-only reshapes: no HBM copies around the kernel
    g_ncp = g.reshape(n, c_g, h * w)
    x_ncp = x.reshape(n, c_x, h * w)
    m_ncp = m_rs.reshape(n, 1, h * w)

    out_ncp = attention_block_pallas(g_ncp, x_ncp, m_ncp, folded, tile_hw=tile_hw)
    return out_ncp.reshape(n, c_x, h, w)


# Pure-JAX reference mirroring the PyTorch forward (NCHW), for verification.
def reference(g, x, masks, raw):
    def conv_bn(inp, p):
        y = jnp.einsum("nchw,co->nohw", inp, p["w"]) + p["b"][None, :, None, None]
        inv = p["gamma"] / jnp.sqrt(p["var"] + EPS)
        return ((y - p["mean"][None, :, None, None]) * inv[None, :, None, None]
                + p["beta"][None, :, None, None])

    g1 = conv_bn(g, raw["W_g"])
    x1 = conv_bn(x, raw["W_x"])
    m_rs = nearest_resize_nchw(masks, g1.shape[2:])
    pre_relu = jnp.concatenate([g1 + x1, m_rs], axis=1)
    psi_in = jnp.maximum(pre_relu, 0.0)
    psi = jax.nn.sigmoid(conv_bn(psi_in, raw["psi"]))
    return x * psi


# --------------------------------- main -------------------------------------- #
if __name__ == "__main__":
    key = jax.random.PRNGKey(0)
    k_g, k_x, k_m, k_p = jax.random.split(key, 4)

    N, H, W = 2, 16, 16
    F_l = 4    # channels of g (W_g input channels)
    F_g = 6    # channels of x (W_x input channels)
    F_int = 8

    g32 = jax.random.normal(k_g, (N, F_l, H, W), jnp.float32)
    x32 = jax.random.normal(k_x, (N, F_g, H, W), jnp.float32)
    m32 = jax.random.uniform(k_m, (N, 1, 8, 8), jnp.float32) - 0.5
    raw = make_params(k_p, F_g, F_l, F_int)

    # f32 I/O path: matches the PyTorch eval-mode forward tightly.
    ref32 = jax.block_until_ready(reference(g32, x32, m32, raw))
    out32 = jax.block_until_ready(attention_block(g32, x32, m32, raw))
    assert out32.shape == (N, F_g, H, W)
    assert jnp.allclose(out32, ref32, atol=1e-4, rtol=1e-4), "f32 mismatch vs reference"

    # bf16-at-the-HBM-boundary path (halves bytes moved; compute stays f32).
    g_b = g32.astype(jnp.bfloat16)
    x_b = x32.astype(jnp.bfloat16)
    m_b = m32.astype(jnp.bfloat16)
    ref_b = jax.block_until_ready(
        reference(g_b.astype(jnp.float32), x_b.astype(jnp.float32),
                  m_b.astype(jnp.float32), raw))
    out_b = jax.block_until_ready(attention_block(g_b, x_b, m_b, raw))
    assert out_b.dtype == jnp.bfloat16
    assert jnp.allclose(out_b.astype(jnp.float32), ref_b, atol=2e-2, rtol=2e-2), \
        "bf16 mismatch vs reference"

    print("KERNEL_OK")
</pallas_src>

<mosaic_0001>
module attributes {stable_mosaic.version = 11 : i64} {
  func.func @_attention_gate_kernel(%arg0: i32, %arg1: i32, %arg2: memref<2xf32, #tpu.memory_space<smem>>, %arg3: memref<1x4x128xf32, #tpu.memory_space<vmem>>, %arg4: memref<1x6x128xf32, #tpu.memory_space<vmem>>, %arg5: memref<1x1x128xf32, #tpu.memory_space<vmem>>, %arg6: memref<8x4xf32, #tpu.memory_space<vmem>>, %arg7: memref<8x6xf32, #tpu.memory_space<vmem>>, %arg8: memref<8x1xf32, #tpu.memory_space<vmem>>, %arg9: memref<1x8xf32, #tpu.memory_space<vmem>>, %arg10: memref<1x6x128xf32, #tpu.memory_space<vmem>>) attributes {dimension_semantics = [#tpu.dimension_semantics<parallel>, #tpu.dimension_semantics<parallel>], iteration_bounds = array<i64: 2, 2>, scalar_prefetch = 0 : i64, scratch_operands = 0 : i64, tpu.core_type = #tpu.core_type<tc>, window_params = [{transform_indices = @transform_0, window_bounds = array<i64: 2>}, {transform_indices = @transform_1, window_bounds = array<i64: 1, 4, 128>}, {transform_indices = @transform_2, window_bounds = array<i64: 1, 6, 128>}, {transform_indices = @transform_3, window_bounds = array<i64: 1, 1, 128>}, {pipeline_mode = #tpu.pipeline_mode<synchronous>, transform_indices = @transform_4, window_bounds = array<i64: 8, 4>}, {pipeline_mode = #tpu.pipeline_mode<synchronous>, transform_indices = @transform_5, window_bounds = array<i64: 8, 6>}, {pipeline_mode = #tpu.pipeline_mode<synchronous>, transform_indices = @transform_6, window_bounds = array<i64: 8, 1>}, {pipeline_mode = #tpu.pipeline_mode<synchronous>, transform_indices = @transform_7, window_bounds = array<i64: 1, 8>}, {transform_indices = @transform_8, window_bounds = array<i64: 1, 6, 128>}]} {
    %c0 = arith.constant 0 : index
    %c0_0 = arith.constant 0 : index
    %c0_1 = arith.constant 0 : index
    %0 = vector.load %arg3[%c0, %c0_0, %c0_1] : memref<1x4x128xf32, #tpu.memory_space<vmem>>, vector<1x4x128xf32>
    %1 = vector.shape_cast %0 : vector<1x4x128xf32> to vector<4x128xf32>
    %c0_2 = arith.constant 0 : index
    %c0_3 = arith.constant 0 : index
    %c0_4 = arith.constant 0 : index
    %2 = vector.load %arg4[%c0_2, %c0_3, %c0_4] : memref<1x6x128xf32, #tpu.memory_space<vmem>>, vector<1x6x128xf32>
    %3 = vector.shape_cast %2 : vector<1x6x128xf32> to vector<6x128xf32>
    %c0_5 = arith.constant 0 : index
    %c0_6 = arith.constant 0 : index
    %c0_7 = arith.constant 0 : index
    %4 = vector.load %arg5[%c0_5, %c0_6, %c0_7] : memref<1x1x128xf32, #tpu.memory_space<vmem>>, vector<1x1x128xf32>
    %5 = vector.shape_cast %4 : vector<1x1x128xf32> to vector<1x128xf32>
    %c0_8 = arith.constant 0 : index
    %c0_9 = arith.constant 0 : index
    %6 = vector.load %arg6[%c0_8, %c0_9] : memref<8x4xf32, #tpu.memory_space<vmem>>, vector<8x4xf32>
    %cst = arith.constant dense<0.000000e+00> : vector<8x128xf32>
    %7 = tpu.matmul %6, %1, %cst {dimension_numbers = #tpu.dot_dimension_numbers<[1], [0], [0], [1], [0, 0, 1, 1], [], []>} : vector<8x4xf32>, vector<4x128xf32>, vector<8x128xf32> -> vector<8x128xf32>
    %c0_10 = arith.constant 0 : index
    %c0_11 = arith.constant 0 : index
    %8 = vector.load %arg7[%c0_10, %c0_11] : memref<8x6xf32, #tpu.memory_space<vmem>>, vector<8x6xf32>
    %cst_12 = arith.constant dense<0.000000e+00> : vector<8x128xf32>
    %9 = tpu.matmul %8, %3, %cst_12 {dimension_numbers = #tpu.dot_dimension_numbers<[1], [0], [0], [1], [0, 0, 1, 1], [], []>} : vector<8x6xf32>, vector<6x128xf32>, vector<8x128xf32> -> vector<8x128xf32>
    %10 = arith.addf %7, %9 : vector<8x128xf32>
    %c0_13 = arith.constant 0 : index
    %c0_14 = arith.constant 0 : index
    %11 = vector.load %arg8[%c0_13, %c0_14] : memref<8x1xf32, #tpu.memory_space<vmem>>, vector<8x1xf32>
    %12 = vector.broadcast %11 : vector<8x1xf32> to vector<8x128xf32>
    %13 = arith.addf %10, %12 : vector<8x128xf32>
    %cst_15 = arith.constant 0.000000e+00 : f32
    %14 = vector.broadcast %cst_15 : f32 to vector<8x128xf32>
    %15 = arith.maximumf %13, %14 : vector<8x128xf32>
    %cst_16 = arith.constant 0.000000e+00 : f32
    %16 = vector.broadcast %cst_16 : f32 to vector<1x128xf32>
    %17 = arith.maximumf %5, %16 : vector<1x128xf32>
    %c0_17 = arith.constant 0 : index
    %c0_18 = arith.constant 0 : index
    %18 = vector.load %arg9[%c0_17, %c0_18] : memref<1x8xf32, #tpu.memory_space<vmem>>, vector<1x8xf32>
    %cst_19 = arith.constant dense<0.000000e+00> : vector<1x128xf32>
    %19 = tpu.matmul %18, %15, %cst_19 {dimension_numbers = #tpu.dot_dimension_numbers<[1], [0], [0], [1], [0, 0, 1, 1], [], []>} : vector<1x8xf32>, vector<8x128xf32>, vector<1x128xf32> -> vector<1x128xf32>
    %c0_20 = arith.constant 0 : index
    %20 = memref.load %arg2[%c0_20] : memref<2xf32, #tpu.memory_space<smem>>
    %21 = vector.broadcast %20 : f32 to vector<1x128xf32>
    %22 = arith.mulf %17, %21 : vector<1x128xf32>
    %23 = arith.addf %19, %22 : vector<1x128xf32>
    %c1 = arith.constant 1 : index
    %24 = memref.load %arg2[%c1] : memref<2xf32, #tpu.memory_space<smem>>
    %25 = vector.broadcast %24 : f32 to vector<1x128xf32>
    %26 = arith.addf %23, %25 : vector<1x128xf32>
    %27 = arith.negf %26 : vector<1x128xf32>
    %28 = math.exp %27 : vector<1x128xf32>
    %cst_21 = arith.constant 1.000000e+00 : f32
    %29 = vector.broadcast %cst_21 : f32 to vector<1x128xf32>
    %30 = arith.addf %29, %28 : vector<1x128xf32>
    %31 = arith.divf %29, %30 : vector<1x128xf32>
    %32 = vector.broadcast %31 : vector<1x128xf32> to vector<6x128xf32>
    %33 = arith.mulf %3, %32 : vector<6x128xf32>
    %c0_22 = arith.constant 0 : index
    %c0_23 = arith.constant 0 : index
    %c0_24 = arith.constant 0 : index
    %34 = vector.load %arg10[%c0_22, %c0_23, %c0_24] : memref<1x6x128xf32, #tpu.memory_space<vmem>>, vector<1x6x128xf32>
    %35 = vector.shape_cast %34 : vector<1x6x128xf32> to vector<6x128xf32>
    %36 = vector.shape_cast %33 : vector<6x128xf32> to vector<1x6x128xf32>
    tpu.vector_store %arg10[%c0_22, %c0_23, %c0_24], %36 {strides = array<i32>} : memref<1x6x128xf32, #tpu.memory_space<vmem>>, vector<1x6x128xf32>,
    return
  }
  func.func @transform_0(%arg0: i32, %arg1: i32) -> i32 {
    %c0_i32 = arith.constant 0 : i32
    %c0_i32_0 = arith.constant 0 : i32
    return %c0_i32 : i32
  }
  func.func @transform_1(%arg0: i32, %arg1: i32) -> (i32, i32, i32) {
    %c0_i32 = arith.constant 0 : i32
    %c0_i32_0 = arith.constant 0 : i32
    return %arg0, %c0_i32, %arg1 : i32, i32, i32
  }
  func.func @transform_2(%arg0: i32, %arg1: i32) -> (i32, i32, i32) {
    %c0_i32 = arith.constant 0 : i32
    %c0_i32_0 = arith.constant 0 : i32
    return %arg0, %c0_i32, %arg1 : i32, i32, i32
  }
  func.func @transform_3(%arg0: i32, %arg1: i32) -> (i32, i32, i32) {
    %c0_i32 = arith.constant 0 : i32
    %c0_i32_0 = arith.constant 0 : i32
    return %arg0, %c0_i32, %arg1 : i32, i32, i32
  }
  func.func @transform_4(%arg0: i32, %arg1: i32) -> (i32, i32) {
    %c0_i32 = arith.constant 0 : i32
    %c0_i32_0 = arith.constant 0 : i32
    %c0_i32_1 = arith.constant 0 : i32
    return %c0_i32, %c0_i32_0 : i32, i32
  }
  func.func @transform_5(%arg0: i32, %arg1: i32) -> (i32, i32) {
    %c0_i32 = arith.constant 0 : i32
    %c0_i32_0 = arith.constant 0 : i32
    %c0_i32_1 = arith.constant 0 : i32
    return %c0_i32, %c0_i32_0 : i32, i32
  }
  func.func @transform_6(%arg0: i32, %arg1: i32) -> (i32, i32) {
    %c0_i32 = arith.constant 0 : i32
    %c0_i32_0 = arith.constant 0 : i32
    %c0_i32_1 = arith.constant 0 : i32
    return %c0_i32, %c0_i32_0 : i32, i32
  }
  func.func @transform_7(%arg0: i32, %arg1: i32) -> (i32, i32) {
    %c0_i32 = arith.constant 0 : i32
    %c0_i32_0 = arith.constant 0 : i32
    %c0_i32_1 = arith.constant 0 : i32
    return %c0_i32, %c0_i32_0 : i32, i32
  }
  func.func @transform_8(%arg0: i32, %arg1: i32) -> (i32, i32, i32) {
    %c0_i32 = arith.constant 0 : i32
    %c0_i32_0 = arith.constant 0 : i32
    return %arg0, %c0_i32, %arg1 : i32, i32, i32
  }
}

</mosaic_0001>

<bundles_post_ra>
// kernel: tpu_custom_call.1
= control target key start
LH: loop header
LB: loop body
LE: loop exit
PB: predicated region body
PF: predicated region fallthrough
CT: control target
= control target key end

     0   :  { %13 = vsyncpa [#allocation3], 0  ;;  %s851_s27 = smov 0   ;;  %s853_s28 = smov 0   ;;  %s937_s0 = inlined_call_operand.vmem [shape: f32[2], index: 0, kind: input, shape index: {}]   ;;  %s938_s1 = inlined_call_operand.vmem [shape: f32[2,4,256], index: 1, kind: input, shape index: {}]   ;;  %s939_s2 = inlined_call_operand.vmem [shape: f32[2,6,256], index: 2, kind: input, shape index: {}]   ;;  %s940_s3 = inlined_call_operand.vmem [shape: f32[2,1,256], index: 3, kind: input, shape index: {}]   ;;  %s941_s4 = inlined_call_operand.vmem [shape: f32[8,4], index: 4, kind: input, shape index: {}]   ;;  %s942_s5 = inlined_call_operand.vmem [shape: f32[8,6], index: 5, kind: input, shape index: {}]   ;;  %s943_s6 = inlined_call_operand.vmem [shape: f32[8,1], index: 6, kind: input, shape index: {}]   ;;  %s944_s7 = inlined_call_operand.vmem [shape: f32[1,8], index: 7, kind: input, shape index: {}]   ;;  %s945_s8 = inlined_call_operand.vmem [shape: f32[2,6,256], index: 8, kind: output, shape index: {}]  }
   0x1   :  { %s855_s29 = smov 0   ;;  %s857_s30 = smov 0  }
   0x2   :  { %s859_s9 = smov 0  }
   0x3 LB: > { %s665_s10 = sadd.s32 4294967295, %s802_s9   ;;  %s28_s11 = sadd.s32 1, %s794_s29  ;;  %s802_s9 = sphi %s859_s9, %s19_s9   ;;  %s798_s30 = sphi %s857_s30, %s949_s30   ;;  %s794_s29 = sphi %s855_s29, %s948_s29   ;;  %s790_s28 = sphi %s853_s28, %s947_s28   ;;  %s786_s27 = sphi %s851_s27, %s946_s27  }
   0x4   : > { %p29_p0 = scmp.ge.s32.totalorder %s28_s11, 2  ;;  %s31_s12 = sadd.s32 1, %s798_s30 }
   0x5   : > { %p667_p1 = scmp.ge.s32.totalorder %s802_s9, 1  ;;  %p253_p2 = scmp.lt.s32.totalorder %s802_s9, 5 }
   0x6   : > { %s951_s11 = smov (%p29_p0, %s28_s11), 0  ;;  %s953_s12 = smov (!%p29_p0, %s31_s12), %s798_s30 }
   0x7   : > { %p254_p3 = pnand %p667_p1, %p253_p2  ;;  %p33_p4 = scmp.ge.s32.totalorder %s953_s12, 2 }
   0x8   : > { %p696_p5 = scmp.eq.s32.totalorder %s665_s10, 0  ;;  %s265_s15 = sshll.u32 %s937_s0, 4  ;;  %s266_s15 = int_to_ptr.vmem [resolvable:$true] %s265_s15 }
   0x9   : > { %p692_p6 = pneg %p254_p3  ;;  %s955_s12 = smov (%p33_p4, %s953_s12), 0 }
   0xa   : > { %s804_s16 = smov [#allocation2]   ;;  %322 = sbr.rel (%p254_p3) target bundleno = 330 (0x14a), region = 52 }
   0xb   : > { %p693_p7 = pnand %p696_p5, %p692_p6 }
   0xd   : > { %695 = dma.vmem_to_smem (!%p693_p7), %s266_s15, 16, %s804_s16, [#allocation3]  }
   0xf   : > { %781 = dma.done.wait (%p696_p5), [#allocation3], 16  }
  0x10   : > { %783 = vsyncadd (%p696_p5), [#allocation3], 4294967280 }
  0x11   : > { %329 = sfence }
  0x12   : > { %p379_p8 = scmp.lt.s32.totalorder %s790_s28, 1  ;;  %p381_p9 = scmp.lt.s32.totalorder %s786_s27, 1  ;;  %v471_v0 = vld [vmem:[%s943_s6] sm:$0xff]  ;;  %v805_v1 = vmov 0   ;;  %vm419_vm0 = vcmask 1045504   ;;  %vm447_vm1 = vcmask 1043456  }
  0x13   : > { %740 = vset.pattern.permute.xlu0 %v805_v1  ;;  %v414_v2 = vld [vmem:[%s942_s5] sm:$0xff]  ;;  %vm415_vm2 = vcmask 48128   ;;  %vm443_vm3 = vcmask 31744   ;;  %vm484_vm4 = vcmask 64512   ;;  %s481_s18 = sld [smem:[#allocation2]] }
  0x14   : > { %s957_s28 = smov (!%p379_p8, %s790_s28), 1  ;;  %s959_s27 = smov (!%p381_p9, %s786_s27), 1  ;;  %474 = vperm.xlu0 %740, %v471_v0   ;;  %v413_v4 = vld [vmem:[%s941_s4] sm:$0xff] }
  0x15   : > { %s672_s19 = sshll.u32 %s957_s28, 1  ;;  %v480_v12 = vld [vmem:[%s944_s7] sm:$0x1]  ;;  %s684_s24 = sld [smem:[#allocation2 + $0x1]] }
  0x16   : > { %s892_s20 = sadd.s32 %s672_s19, %s959_s27 }
  0x17   : > { %s675_s21 = sshll.u32 %s892_s20, 3  ;;  %s673_s22 = sshll.u32 %s892_s20, 2 }
  0x18   : > { %s394_s25 = scalar_lea.vmem %s939_s2, %s675_s21  ;;  %s386_s13 = scalar_lea.vmem %s938_s1, %s673_s22 }
  0x19   : > { %v411_v3 = vld [vmem:[%s394_s25] sm:$0x3f]  ;;  %s401_s23 = scalar_lea.vmem %s940_s3, %s892_s20  ;;  %v482_v15 = vstv %s481_s18  ;;  %s409_s10 = scalar_lea.vmem %s945_s8, %s675_s21 }
  0x1a   : > { %679 = vmatpush.msk.msra.mxu0 %vm419_vm0, %v411_v3  ;;  %v410_v5 = vld [vmem:[%s386_s13] sm:$0xf] }
  0x1b   : > { %681 = vmatpush.msk.msra.mxu1 %vm447_vm1, %v410_v5  ;;  %680 = vmatmul.msk.f32.vlgmr.msra.gmra.mxu0 %vm415_vm2, %v414_v2  ;;  %v412_v13 = vld [vmem:[%s401_s23] sm:$0x1]  ;;  %v509_v18 = vstv %s684_s24 }
  0x1c   : > { %682 = vmatmul.msk.f32.vlgmr.msra.gmra.mxu1 %vm443_vm3, %v413_v4  ;;  %v479_v14 = vmax.f32 %v412_v13, 0.0 }
  0x1e   : > { %v483_v16 = vmul.f32 %v482_v15, %v479_v14 }
  0x86   : > { %v475_v8 = vpop.permute.xlu0 %474 }
  0x98   : > { %v440_v6 = vpop.f32.mrf.mxu0 }
  0x99   : > { %v468_v7 = vpop.f32.mrf.mxu1 }
  0x9a   : > { %v469_v9 = vadd.f32 %v468_v7, %v440_v6 }
  0x9c   : > { %v477_v10 = vadd.f32 %v475_v8, %v469_v9 }
  0x9e   : > { %v478_v11 = vmax.f32 %v477_v10, 0.0 }
  0xa0   : > { %503 = vmatpush.msra.mxu2 %v478_v11 }
  0xa1   : > { %683 = vmatmul.msk.f32.vlgmr.msra.gmra.mxu2 %vm484_vm4, %v480_v12 }
 0x124   : > { %v505_v17 = vpop.f32.mrf.mxu2 }
 0x125   : > { %v506_v19 = vadd.f32 %v505_v17, %v483_v16 }
 0x127   : > { %v510_v20 = vadd.f32 %v509_v18, %v506_v19 }
 0x129   : > { %v685_v21 = vmul.f32 -1.442695, %v510_v20 }
 0x12b   : > { %741 = vpow2.f32 %v685_v21 }
 0x131   : > { %v742_v22 = vpop.eup %741 }
 0x132   : > { %v514_v23 = vadd.f32 1.0, %v742_v22 }
 0x134   : > { %743 = vrcp.f32 %v514_v23  ;;  %v526_v27 = vand.u32 2147483648, %v514_v23  ;;  %v524_v29 = vand.u32 2147483647, %v514_v23  ;;  %vm520_vm6 = vweird.f32 %v514_v23 }
 0x136   : > { %v527_v31 = vor.u32 1.1754944e-38, %v526_v27  ;;  %vm525_vm8 = vcmp.eq.f32.partialorder %v524_v29, 8.507059e+37 }
 0x13a   : > { %v744_v24 = vpop.eup %743 }
 0x13b   : > { %v516_v25 = vmul.f32 %v744_v24, %v514_v23  ;;  %vm521_vm5 = vweird.f32 %v744_v24 }
 0x13c   : > { %vm522_vm7 = vmor %vm520_vm6, %vm521_vm5 }
 0x13d   : > { %v517_v26 = vsub.f32 1.0, %v516_v25 }
 0x13f   : > { %v518_v28 = vmul.f32 %v744_v24, %v517_v26 }
 0x141   : > { %v519_v30 = vadd.f32 %v744_v24, %v518_v28 }
 0x143   : > { %v523_v32 = vsel %vm522_vm7, %v744_v24, %v519_v30 }
 0x144   : > { %v528_v33 = vsel %vm525_vm8, %v527_v31, %v523_v32 }
 0x145   : > { %v530_v34 = vperm.slane %v528_v33, 0 }
 0x147   : > { %v531_v35 = vmul.f32 %v530_v34, %v411_v3 }
 0x149   : > { %532 = vst [vmem:[%s409_s10] sm:$0x3f] %v531_v35 }
 0x14a PF: > { %s19_s9 = sadd.s32 1, %s802_s9   ;;  %s946_s27 = smov %s794_s29 }
 0x14b   : > { %p16_p10 = scmp.ge.s32.totalorder %s19_s9, 6   ;;  %s947_s28 = smov %s798_s30 }
 0x14c   : > { %s948_s29 = smov %s951_s11  ;;  %s949_s30 = smov %s955_s12 }
 0x14d   :  { %18 = sbr.rel (!%p16_p10) target bundleno = 3 (0x3), region = 93 }
 0x152   :  { %560 = vsyncpa [#allocation3], 1 }
 0x153   :  { %562 = vsyncpa [#allocation3 + $0x1], 1 }

</bundles_post_ra>
